<compile_context>
chip_gen: v7x
topology: tpu7x:2x2x1
jax: 0.10.0
libtpu: 0.0.40
codegen_flags: <defaults>
</compile_context>

<pallas_src>
import jax
import jax.numpy as jnp
from jax import lax
from jax.experimental import pallas as pl
from jax.experimental.pallas import tpu as pltpu

HIDDEN = 400        # fixed by the module (nn.Linear(mirna_length, 400))
HIDDEN_PAD = 512    # lane-dense padding of the hidden dim (4 x 128)
BN_EPS = 1e-5       # PyTorch BatchNorm1d default eps
LANE = 128
SUBLANE = 8


def _round_up(x, m):
    return (x + m - 1) // m * m


# --------------------------------------------------------------------------
# Kernel: two fused (Linear + folded-BN + ReLU) stages on one batch tile.
# --------------------------------------------------------------------------
def mirnanet_kernel(x_ref, w1_ref, b1_ref, w2_ref, b2_ref, o_ref):
    # Stage 1: x @ W1' + b1' -> ReLU   (BN1 folded; dropout = identity)
    x = x_ref[...].astype(jnp.bfloat16)           # on-chip cast: x crosses HBM once, as f32
    h = jnp.dot(x, w1_ref[...], preferred_element_type=jnp.float32)
    h = jnp.maximum(h + b1_ref[...], 0.0)

    # Stage 2: h @ W2' + b2' -> ReLU   (BN2 folded; dropout = identity)
    o = jnp.dot(h.astype(jnp.bfloat16), w2_ref[...],
                preferred_element_type=jnp.float32)
    o = jnp.maximum(o + b2_ref[...], 0.0)
    o_ref[...] = o.astype(o_ref.dtype)            # bf16 writeback halves the output stream


# --------------------------------------------------------------------------
# Host-side parameter preparation: fold BN, pad output dims, cast to bf16.
# --------------------------------------------------------------------------
def _fold_bn(w, b, gamma, beta, mean, var, eps=BN_EPS):
    s = gamma * lax.rsqrt(var + eps)              # (out,)
    return w * s[None, :], (b - mean) * s + beta


def prepare_params(params):
    """Fold eval-mode BN into the linears; pad only the *output* dims to
    lane-dense widths (K dims stay unpadded — full-array blocks are legal);
    weights bf16, biases f32."""
    m_len = params["w2"].shape[1]
    m_pad = _round_up(m_len, LANE)

    w1, b1 = _fold_bn(params["w1"], params["b1"], params["bn1_gamma"],
                      params["bn1_beta"], params["bn1_mean"], params["bn1_var"])
    w2, b2 = _fold_bn(params["w2"], params["b2"], params["bn2_gamma"],
                      params["bn2_beta"], params["bn2_mean"], params["bn2_var"])

    w1 = jnp.pad(w1, ((0, 0), (0, HIDDEN_PAD - HIDDEN))).astype(jnp.bfloat16)
    b1 = jnp.pad(b1, (0, HIDDEN_PAD - HIDDEN)).reshape(1, HIDDEN_PAD).astype(jnp.float32)
    w2 = jnp.pad(w2, ((0, HIDDEN_PAD - HIDDEN), (0, m_pad - m_len))).astype(jnp.bfloat16)
    b2 = jnp.pad(b2, (0, m_pad - m_len)).reshape(1, m_pad).astype(jnp.float32)
    return w1, b1, w2, b2, m_pad


# --------------------------------------------------------------------------
# Wrapper
# --------------------------------------------------------------------------
def mirnanet_forward(x, params, *, block_batch=None, out_dtype=jnp.float32):
    """x: (B, mirna_length) float32. Returns (B, m_length) `out_dtype`."""
    B, d_in = x.shape
    m_len = params["w2"].shape[1]

    w1, b1, w2, b2, m_pad = prepare_params(params)
    param_bytes = w1.size * 2 + w2.size * 2 + b1.size * 4 + b2.size * 4

    # Device-aware VMEM capacity (64 MiB per TC on v7x, 128 MiB on v5e/v6e).
    try:
        vmem_cap = int(pltpu.get_tpu_info().vmem_capacity_bytes)
    except Exception:
        vmem_cap = 64 << 20  # conservative fallback

    # Per-row VMEM cost of a batch tile (double-buffered x/out, f32+bf16 h).
    d_in_lanes = _round_up(d_in, LANE)            # lane-dim layout rounding in VMEM
    per_row = (2 * d_in_lanes * 4                 # x tile, f32, 2 buffers
               + 2 * m_pad * 2                    # out tile, bf16, 2 buffers
               + HIDDEN_PAD * (4 + 2))            # f32 h + bf16 copy
    budget = vmem_cap - 2 * param_bytes - (8 << 20)
    max_rows = max(SUBLANE, (budget // per_row) // SUBLANE * SUBLANE)

    # Batch tile: target ~1024 rows, >= 2 grid steps whenever B > 8 (megacore
    # on v7x), minimal zero-row padding, capped by the VMEM budget.
    if block_batch is None:
        n_tiles = max(pl.cdiv(B, 1024), 2 if B > SUBLANE else 1)
        block_batch = pl.cdiv(B, n_tiles)
    block_batch = int(min(max(SUBLANE, _round_up(block_batch, SUBLANE)), max_rows))
    b_pad = _round_up(B, block_batch)
    grid = (b_pad // block_batch,)

    # Pad only the batch dim; x stays f32 (cast to bf16 inside the kernel).
    x_p = x.astype(jnp.float32)
    if b_pad != B:
        x_p = jnp.pad(x_p, ((0, b_pad - B), (0, 0)))

    # Scheduler hint for XLA.
    flops = 2 * b_pad * (d_in * HIDDEN_PAD + HIDDEN_PAD * m_pad)
    bytes_accessed = x_p.size * 4 + param_bytes + b_pad * m_pad * 2
    cost = pl.CostEstimate(flops=flops, transcendentals=0,
                           bytes_accessed=bytes_accessed)

    vmem_bytes = block_batch * per_row + 2 * param_bytes + (4 << 20)
    vmem_limit = int(min(max(vmem_bytes, 16 << 20),
                         min(vmem_cap - (8 << 20), 100 << 20)))

    def resident(a):
        # Full-array block with a constant block index: stays resident in VMEM
        # across the whole batch grid (no per-step re-DMA).
        return pl.BlockSpec(a.shape, lambda i: (0, 0))

    out_p = pl.pallas_call(
        mirnanet_kernel,
        out_shape=jax.ShapeDtypeStruct((b_pad, m_pad), jnp.bfloat16),
        grid_spec=pltpu.PrefetchScalarGridSpec(
            num_scalar_prefetch=0,
            grid=grid,
            in_specs=[
                pl.BlockSpec((block_batch, d_in), lambda i: (i, 0)),
                resident(w1), resident(b1), resident(w2), resident(b2),
            ],
            out_specs=pl.BlockSpec((block_batch, m_pad), lambda i: (i, 0)),
        ),
        compiler_params=pltpu.CompilerParams(
            dimension_semantics=("parallel",),
            vmem_limit_bytes=vmem_limit,
        ),
        cost_estimate=cost,
    )(x_p, w1, b1, w2, b2)

    return out_p[:B, :m_len].astype(out_dtype)


# --------------------------------------------------------------------------
# Synthetic params + pure-JAX reference (eval-mode forward)
# --------------------------------------------------------------------------
def init_params(key, mirna_length, m_length):
    ks = jax.random.split(key, 8)
    return {
        "w1": jax.random.normal(ks[0], (mirna_length, HIDDEN), jnp.float32) * 0.05,
        "b1": jax.random.normal(ks[1], (HIDDEN,), jnp.float32) * 0.01,
        "bn1_gamma": 1.0 + 0.1 * jax.random.normal(ks[2], (HIDDEN,), jnp.float32),
        "bn1_beta": 0.1 * jax.random.normal(ks[3], (HIDDEN,), jnp.float32),
        "bn1_mean": 0.05 * jax.random.normal(ks[4], (HIDDEN,), jnp.float32),
        "bn1_var": jnp.abs(1.0 + 0.1 * jax.random.normal(ks[5], (HIDDEN,), jnp.float32)),
        "w2": jax.random.normal(ks[6], (HIDDEN, m_length), jnp.float32) * 0.05,
        "b2": jax.random.normal(ks[7], (m_length,), jnp.float32) * 0.01,
        "bn2_gamma": jnp.ones((m_length,), jnp.float32),
        "bn2_beta": jnp.zeros((m_length,), jnp.float32),
        "bn2_mean": jnp.zeros((m_length,), jnp.float32),
        "bn2_var": jnp.ones((m_length,), jnp.float32),
    }


def reference_forward(x, p):
    h = x @ p["w1"] + p["b1"]
    h = (h - p["bn1_mean"]) / jnp.sqrt(p["bn1_var"] + BN_EPS) * p["bn1_gamma"] + p["bn1_beta"]
    h = jnp.maximum(h, 0.0)
    o = h @ p["w2"] + p["b2"]
    o = (o - p["bn2_mean"]) / jnp.sqrt(p["bn2_var"] + BN_EPS) * p["bn2_gamma"] + p["bn2_beta"]
    return jnp.maximum(o, 0.0)


if __name__ == "__main__":
    key = jax.random.PRNGKey(0)
    k_x, k_x2, k_p = jax.random.split(key, 3)

    mirna_length = 32   # input dimension of miRNA modality (small test size)
    m_length = 16       # output dimension (small test size)
    params = init_params(k_p, mirna_length, m_length)

    # Small single-tile batch.
    x = jax.random.normal(k_x, (8, mirna_length), jnp.float32)
    out = jax.block_until_ready(mirnanet_forward(x, params))
    ref = reference_forward(x, params)
    assert out.shape == (8, m_length)
    assert jnp.allclose(out, ref, atol=5e-2, rtol=5e-2), "mismatch (batch=8)"

    # Ragged batch -> multi-step grid (exercises batch padding + pipelining
    # and the >=2-step megacore split).
    x2 = jax.random.normal(k_x2, (24, mirna_length), jnp.float32)
    out2 = jax.block_until_ready(mirnanet_forward(x2, params))
    ref2 = reference_forward(x2, params)
    assert out2.shape == (24, m_length)
    assert jnp.allclose(out2, ref2, atol=5e-2, rtol=5e-2), "mismatch (batch=24)"

    print("KERNEL_OK")
</pallas_src>

<mosaic_0001>
module attributes {stable_mosaic.version = 11 : i64} {
  func.func @mirnanet_kernel(%arg0: i32, %arg1: memref<8x32xf32, #tpu.memory_space<vmem>>, %arg2: memref<32x512xbf16, #tpu.memory_space<vmem>>, %arg3: memref<1x512xf32, #tpu.memory_space<vmem>>, %arg4: memref<512x128xbf16, #tpu.memory_space<vmem>>, %arg5: memref<1x128xf32, #tpu.memory_space<vmem>>, %arg6: memref<8x128xbf16, #tpu.memory_space<vmem>>) attributes {dimension_semantics = [#tpu.dimension_semantics<parallel>], iteration_bounds = array<i64: 1>, scalar_prefetch = 0 : i64, scratch_operands = 0 : i64, tpu.core_type = #tpu.core_type<tc>, window_params = [{transform_indices = @transform_0, window_bounds = array<i64: 8, 32>}, {pipeline_mode = #tpu.pipeline_mode<synchronous>, transform_indices = @transform_1, window_bounds = array<i64: 32, 512>}, {pipeline_mode = #tpu.pipeline_mode<synchronous>, transform_indices = @transform_2, window_bounds = array<i64: 1, 512>}, {pipeline_mode = #tpu.pipeline_mode<synchronous>, transform_indices = @transform_3, window_bounds = array<i64: 512, 128>}, {pipeline_mode = #tpu.pipeline_mode<synchronous>, transform_indices = @transform_4, window_bounds = array<i64: 1, 128>}, {transform_indices = @transform_5, window_bounds = array<i64: 8, 128>}]} {
    %c0 = arith.constant 0 : index
    %c0_0 = arith.constant 0 : index
    %0 = vector.load %arg1[%c0, %c0_0] : memref<8x32xf32, #tpu.memory_space<vmem>>, vector<8x32xf32>
    %1 = arith.truncf %0 : vector<8x32xf32> to vector<8x32xbf16>
    %c0_1 = arith.constant 0 : index
    %c0_2 = arith.constant 0 : index
    %2 = vector.load %arg2[%c0_1, %c0_2] : memref<32x512xbf16, #tpu.memory_space<vmem>>, vector<32x512xbf16>
    %cst = arith.constant dense<0.000000e+00> : vector<8x512xf32>
    %3 = tpu.matmul %1, %2, %cst {dimension_numbers = #tpu.dot_dimension_numbers<[1], [0], [0], [1], [0, 0, 1, 1], [], []>} : vector<8x32xbf16>, vector<32x512xbf16>, vector<8x512xf32> -> vector<8x512xf32>
    %c0_3 = arith.constant 0 : index
    %c0_4 = arith.constant 0 : index
    %4 = vector.load %arg3[%c0_3, %c0_4] : memref<1x512xf32, #tpu.memory_space<vmem>>, vector<1x512xf32>
    %5 = vector.broadcast %4 : vector<1x512xf32> to vector<8x512xf32>
    %6 = arith.addf %3, %5 : vector<8x512xf32>
    %cst_5 = arith.constant 0.000000e+00 : f32
    %7 = vector.broadcast %cst_5 : f32 to vector<8x512xf32>
    %8 = arith.maximumf %6, %7 : vector<8x512xf32>
    %9 = arith.truncf %8 : vector<8x512xf32> to vector<8x512xbf16>
    %c0_6 = arith.constant 0 : index
    %c0_7 = arith.constant 0 : index
    %10 = vector.load %arg4[%c0_6, %c0_7] : memref<512x128xbf16, #tpu.memory_space<vmem>>, vector<512x128xbf16>
    %cst_8 = arith.constant dense<0.000000e+00> : vector<8x128xf32>
    %11 = tpu.matmul %9, %10, %cst_8 {dimension_numbers = #tpu.dot_dimension_numbers<[1], [0], [0], [1], [0, 0, 1, 1], [], []>} : vector<8x512xbf16>, vector<512x128xbf16>, vector<8x128xf32> -> vector<8x128xf32>
    %c0_9 = arith.constant 0 : index
    %c0_10 = arith.constant 0 : index
    %12 = vector.load %arg5[%c0_9, %c0_10] : memref<1x128xf32, #tpu.memory_space<vmem>>, vector<1x128xf32>
    %13 = vector.broadcast %12 : vector<1x128xf32> to vector<8x128xf32>
    %14 = arith.addf %11, %13 : vector<8x128xf32>
    %cst_11 = arith.constant 0.000000e+00 : f32
    %15 = vector.broadcast %cst_11 : f32 to vector<8x128xf32>
    %16 = arith.maximumf %14, %15 : vector<8x128xf32>
    %17 = arith.truncf %16 : vector<8x128xf32> to vector<8x128xbf16>
    %c0_12 = arith.constant 0 : index
    %c0_13 = arith.constant 0 : index
    %18 = vector.load %arg6[%c0_12, %c0_13] : memref<8x128xbf16, #tpu.memory_space<vmem>>, vector<8x128xbf16>
    tpu.vector_store %arg6[%c0_12, %c0_13], %17 {strides = array<i32>} : memref<8x128xbf16, #tpu.memory_space<vmem>>, vector<8x128xbf16>,
    return
  }
  func.func @transform_0(%arg0: i32) -> (i32, i32) {
    %c0_i32 = arith.constant 0 : i32
    %c0_i32_0 = arith.constant 0 : i32
    return %arg0, %c0_i32 : i32, i32
  }
  func.func @transform_1(%arg0: i32) -> (i32, i32) {
    %c0_i32 = arith.constant 0 : i32
    %c0_i32_0 = arith.constant 0 : i32
    %c0_i32_1 = arith.constant 0 : i32
    return %c0_i32, %c0_i32_0 : i32, i32
  }
  func.func @transform_2(%arg0: i32) -> (i32, i32) {
    %c0_i32 = arith.constant 0 : i32
    %c0_i32_0 = arith.constant 0 : i32
    %c0_i32_1 = arith.constant 0 : i32
    return %c0_i32, %c0_i32_0 : i32, i32
  }
  func.func @transform_3(%arg0: i32) -> (i32, i32) {
    %c0_i32 = arith.constant 0 : i32
    %c0_i32_0 = arith.constant 0 : i32
    %c0_i32_1 = arith.constant 0 : i32
    return %c0_i32, %c0_i32_0 : i32, i32
  }
  func.func @transform_4(%arg0: i32) -> (i32, i32) {
    %c0_i32 = arith.constant 0 : i32
    %c0_i32_0 = arith.constant 0 : i32
    %c0_i32_1 = arith.constant 0 : i32
    return %c0_i32, %c0_i32_0 : i32, i32
  }
  func.func @transform_5(%arg0: i32) -> (i32, i32) {
    %c0_i32 = arith.constant 0 : i32
    %c0_i32_0 = arith.constant 0 : i32
    return %arg0, %c0_i32 : i32, i32
  }
}

</mosaic_0001>

<bundles_post_ra>
// kernel: tpu_custom_call.1
= control target key start
LH: loop header
LB: loop body
LE: loop exit
PB: predicated region body
PF: predicated region fallthrough
CT: control target
= control target key end

     0   :  { %10 = vsyncpa [#allocation3], 0  ;;  %s916_s0 = inlined_call_operand.hbm [shape: f32[8,32], index: 0, kind: input, shape index: {}]   ;;  %s917_s1 = inlined_call_operand.hbm [shape: bf16[32,512], index: 1, kind: input, shape index: {}]   ;;  %s918_s2 = inlined_call_operand.vmem [shape: f32[1,512], index: 2, kind: input, shape index: {}]   ;;  %s919_s3 = inlined_call_operand.hbm [shape: bf16[512,128], index: 3, kind: input, shape index: {}]   ;;  %s920_s4 = inlined_call_operand.vmem [shape: f32[1,128], index: 4, kind: input, shape index: {}]   ;;  %s921_s5 = inlined_call_operand.hbm [shape: bf16[8,128], index: 5, kind: output, shape index: {}]  }
   0x1   :  { %11 = vsyncpa [#allocation6], 0 }
   0x2   :  { %12 = vsyncpa [#allocation4], 0  ;;  %s823_s18 = smov [#allocation5]   ;;  %s729_s22 = scalar_lea.hbm %s917_s1, 1024 }
   0x3   :  { %s28_s19 = sshll.u32 %s823_s18, 4  ;;  %p730_p0 = scmp.ne.s32.totalorder %s917_s1, %s729_s22  ;;  %s29_s19 = int_to_ptr.vmem [resolvable:$true] %s28_s19 }
   0x4   :  { %p733_p1 = scmp.lt.u32.totalorder %s729_s22, %s917_s1 }
   0x6   :  { %p735_p2 = pnand %p733_p1, %p730_p0 }
   0x8   :  { %738 = shalt.err (!%p735_p2)
}
   0x9   :  { %s739_s27 = scalar_lea.vmem %s29_s19, 1024  ;;  %p744_p4 = scmp.lt.s32.totalorder %s29_s19, %s29_s19 }
   0xa   :  { %p740_p3 = scmp.ne.s32.totalorder %s29_s19, %s739_s27  ;;  %p745_p5 = scmp.lt.s32.totalorder %s739_s27, %s739_s27 }
   0xc   :  { %p746_p6 = por %p745_p5, %p744_p4 }
   0xe   :  { %p747_p7 = pnand %p746_p6, %p740_p3 }
  0x10   :  { %750 = shalt.err (!%p747_p7)
}
  0x11   :  { %s824_s28 = smov 256   ;;  %s825_s29 = smov 16  }
  0x12   :  { %34 = dma.hbm_to_vmem [thread:$0]  %s917_s1, 1024, %s29_s19, [#allocation6], %s824_s28, %s824_s28, %s825_s29  }
  0x13   :  { %s826_s7 = smov [#allocation2]   ;;  %s827_s9 = smov [#allocation7]  }
  0x14   :  { %s19_s8 = sshll.u32 %s826_s7, 4  ;;  %s42_s10 = sshll.u32 %s827_s9, 4  ;;  %s20_s8 = int_to_ptr.vmem [resolvable:$true] %s19_s8  ;;  %s43_s10 = int_to_ptr.vmem [resolvable:$true] %s42_s10 }
  0x15   :  { %s751_s13 = scalar_lea.hbm %s916_s0, 128 }
  0x16   :  { %p752_p8 = scmp.ne.s32.totalorder %s916_s0, %s751_s13  ;;  %p755_p9 = scmp.lt.u32.totalorder %s751_s13, %s916_s0 }
  0x18   :  { %p757_p10 = pnand %p755_p9, %p752_p8 }
  0x1a   :  { %760 = shalt.err (!%p757_p10)
}
  0x1b   :  { %s761_s1 = scalar_lea.vmem %s20_s8, 128  ;;  %p766_p12 = scmp.lt.s32.totalorder %s20_s8, %s20_s8 }
  0x1c   :  { %p762_p11 = scmp.ne.s32.totalorder %s20_s8, %s761_s1  ;;  %p767_p13 = scmp.lt.s32.totalorder %s761_s1, %s761_s1 }
  0x1e   :  { %p768_p0 = por %p767_p13, %p766_p12 }
  0x20   :  { %p769_p1 = pnand %p768_p0, %p762_p11 }
  0x22   :  { %772 = shalt.err (!%p769_p1)
}
  0x23   :  { %22 = dma.hbm_to_vmem [thread:$0]  %s916_s0, 128, %s20_s8, [#allocation3]  }
  0x24   :  { %s773_s22 = scalar_lea.hbm %s919_s3, 4096 }
  0x25   :  { %p774_p2 = scmp.ne.s32.totalorder %s919_s3, %s773_s22  ;;  %p777_p3 = scmp.lt.u32.totalorder %s773_s22, %s919_s3 }
  0x27   :  { %p779_p4 = pnand %p777_p3, %p774_p2 }
  0x29   :  { %782 = shalt.err (!%p779_p4)
}
  0x2a   :  { %s783_s27 = scalar_lea.vmem %s43_s10, 4096  ;;  %p788_p6 = scmp.lt.s32.totalorder %s43_s10, %s43_s10 }
  0x2b   :  { %p784_p5 = scmp.ne.s32.totalorder %s43_s10, %s783_s27  ;;  %p789_p7 = scmp.lt.s32.totalorder %s783_s27, %s783_s27 }
  0x2d   :  { %p790_p8 = por %p789_p7, %p788_p6 }
  0x2f   :  { %p791_p9 = pnand %p790_p8, %p784_p5 }
  0x31   :  { %794 = shalt.err (!%p791_p9)
}
  0x32   :  { %s828_s0 = smov 64   ;;  %s829_s28 = smov 4  }
  0x33   :  { %48 = dma.hbm_to_vmem [thread:$0]  %s919_s3, 4096, %s43_s10, [#allocation6], %s828_s0, %s828_s0, %s829_s28  }
  0x34   :  { %817 = dma.done.wait [#allocation3], 128  }
  0x35   :  { %818 = vsyncadd [#allocation3], 4294967168 }
  0x36   :  { %819 = dma.done.wait [#allocation6], 5120  }
  0x37   :  { %820 = vsyncadd [#allocation6], 4294962176  ;;  %v830_v0 = vmov 0   ;;  %v685_v1 = vld [vmem:[#allocation5 + $0x4] ss:$16 sps:$4 sm:$0xff]   ;;  %v61_v9 = vld [vmem:[#allocation2] sm:$0xff]  ;;  %v73_v43 = vlaneseq }
  0x38   :  { %169 = vmatprep.mubr.bf16.mxu0 %v830_v0  ;;  %210 = vmatprep.mubr.bf16.mxu1 %v830_v0  ;;  %v687_v2 = vld [vmem:[#allocation5 + $0xc] ss:$16 sps:$4 sm:$0xff]   ;;  %v689_v3 = vld [vmem:[#allocation5] ss:$16 sps:$4 sm:$0xff]   ;;  %v690_v4 = vld [vmem:[#allocation5 + $0x8] ss:$16 sps:$4 sm:$0xff]   ;;  %v62_v11 = vpack.c.bf16 %v61_v9, %v61_v9 }
  0x39   :  { %137 = vmatprep.subr.bf16.mxu0 %v685_v1  ;;  %178 = vmatprep.subr.bf16.mxu1 %v687_v2  ;;  %v691_v5 = vld [vmem:[#allocation5 + $0x24] ss:$16 sps:$4 sm:$0xff]   ;;  %v693_v6 = vld [vmem:[#allocation5 + $0x2c] ss:$16 sps:$4 sm:$0xff]   ;;  %v695_v7 = vld [vmem:[#allocation5 + $0x20] ss:$16 sps:$4 sm:$0xff]  }
  0x3a   :  { %138 = vmatpush1.bf16.msra.mxu0 %v689_v3  ;;  %179 = vmatpush1.bf16.msra.mxu1 %v690_v4  ;;  %v696_v8 = vld [vmem:[#allocation5 + $0x28] ss:$16 sps:$4 sm:$0xff]   ;;  %v697_v10 = vld [vmem:[#allocation7 + $0x40] sm:$0xff]   ;;  %vm133_vm0 = vcmask 261120   ;;  %v705_v19 = vld [vmem:[#allocation7 + $0x50] sm:$0xff]   ;;  %v74_v44 = vshrl.u32 %v73_v43, 7 }
  0x3b   :  { %139 = vmatprep.subr.bf16.mxu0 %v691_v5  ;;  %180 = vmatprep.subr.bf16.mxu1 %v693_v6  ;;  %v698_v12 = vld [vmem:[#allocation7 + $0xc0] sm:$0xff]   ;;  %v701_v15 = vld [vmem:[#allocation7 + $0x48] sm:$0xff]   ;;  %v706_v20 = vld [vmem:[#allocation7 + $0xd0] sm:$0xff]   ;;  %s831_s8 = smov [#allocation8]  }
  0x3c   :  { %v699_v13 = vld [vmem:[#allocation7] sm:$0xff]   ;;  %v702_v16 = vld [vmem:[#allocation7 + $0xc8] sm:$0xff]   ;;  %v707_v21 = vld [vmem:[#allocation7 + $0x10] sm:$0xff]   ;;  %v75_v45 = vsub.s32 0, %v74_v44  ;;  %v83_v46 = vsub.s32 2, %v74_v44  ;;  %v79_v48 = vsub.s32 1, %v74_v44 }
  0x3d   :  { %v700_v14 = vld [vmem:[#allocation7 + $0x80] sm:$0xff]   ;;  %v703_v17 = vld [vmem:[#allocation7 + $0x8] sm:$0xff]   ;;  %v708_v22 = vld [vmem:[#allocation7 + $0x90] sm:$0xff]   ;;  %v87_v49 = vsub.s32 3, %v74_v44  ;;  %s579_s9 = sshll.u32 %s831_s8, 4  ;;  %s580_s9 = int_to_ptr.vmem [resolvable:$true] %s579_s9 }
  0x3e   :  { %140 = vmatpush1.bf16.msra.mxu0 %v695_v7  ;;  %181 = vmatpush1.bf16.msra.mxu1 %v696_v8  ;;  %v704_v18 = vld [vmem:[#allocation7 + $0x88] sm:$0xff]   ;;  %v709_v23 = vld [vmem:[#allocation7 + $0x58] sm:$0xff]   ;;  %v713_v27 = vld [vmem:[#allocation7 + $0x60] sm:$0xff]   ;;  %s795_s10 = scalar_lea.vmem %s580_s9, 64  ;;  %p800_p11 = scmp.lt.s32.totalorder %s580_s9, %s580_s9 }
  0x3f   :  { %632 = vmatprep.subr.bf16.mxu0 %v697_v10  ;;  %654 = vmatprep.subr.bf16.mxu1 %v698_v12  ;;  %v710_v24 = vld [vmem:[#allocation7 + $0xd8] sm:$0xff]   ;;  %v714_v28 = vld [vmem:[#allocation7 + $0xe0] sm:$0xff]   ;;  %v717_v31 = vld [vmem:[#allocation7 + $0x68] sm:$0xff]   ;;  %p796_p10 = scmp.ne.s32.totalorder %s580_s9, %s795_s10  ;;  %p801_p12 = scmp.lt.s32.totalorder %s795_s10, %s795_s10 }
  0x40   :  { %v711_v25 = vld [vmem:[#allocation7 + $0x18] sm:$0xff]   ;;  %v715_v29 = vld [vmem:[#allocation7 + $0x20] sm:$0xff]   ;;  %v718_v32 = vld [vmem:[#allocation7 + $0xe8] sm:$0xff]  }
  0x41   :  { %597 = vmatmul.mubr.msk.bf16.vlgmr.msra.gmra.mrb[0].mxu0 %vm133_vm0, %v62_v11  ;;  %598 = vmatmul.mubr.msk.bf16.vlgmr.msra.gmra.mrb[0].mxu1 %vm133_vm0, %v62_v11  ;;  %v712_v26 = vld [vmem:[#allocation7 + $0x98] sm:$0xff]   ;;  %v716_v30 = vld [vmem:[#allocation7 + $0xa0] sm:$0xff]   ;;  %v719_v33 = vld [vmem:[#allocation7 + $0x28] sm:$0xff]   ;;  %p802_p13 = por %p801_p12, %p800_p11 }
  0x42   :  { %633 = vmatpush3.bf16.msra.mxu0 %v699_v13  ;;  %655 = vmatpush3.bf16.msra.mxu1 %v700_v14  ;;  %v720_v34 = vld [vmem:[#allocation7 + $0xa8] sm:$0xff]   ;;  %v721_v35 = vld [vmem:[#allocation7 + $0x70] sm:$0xff]   ;;  %v725_v39 = vld [vmem:[#allocation7 + $0x78] sm:$0xff]  }
  0x43   :  { %634 = vmatprep.subr.bf16.mxu0 %v701_v15  ;;  %656 = vmatprep.subr.bf16.mxu1 %v702_v16  ;;  %v722_v36 = vld [vmem:[#allocation7 + $0xf0] sm:$0xff]   ;;  %v726_v40 = vld [vmem:[#allocation7 + $0xf8] sm:$0xff]   ;;  %p803_p0 = pnand %p802_p13, %p796_p10 }
  0x44   :  { %v723_v37 = vld [vmem:[#allocation7 + $0x30] sm:$0xff]   ;;  %v727_v41 = vld [vmem:[#allocation7 + $0x38] sm:$0xff]  }
  0x45   :  { %v724_v38 = vld [vmem:[#allocation7 + $0xb0] sm:$0xff]   ;;  %v728_v42 = vld [vmem:[#allocation7 + $0xb8] sm:$0xff]  }
  0x46   :  { %635 = vmatpush3.bf16.msra.mxu0 %v703_v17  ;;  %657 = vmatpush3.bf16.msra.mxu1 %v704_v18  ;;  %v71_v47 = vld [vmem:[%s918_s2] sm:$0xf] }
  0x47   :  { %636 = vmatprep.subr.bf16.mxu0 %v705_v19  ;;  %658 = vmatprep.subr.bf16.mxu1 %v706_v20  ;;  %v76_v50 = vrot.slane %v71_v47, %v75_v45  ;;  %v84_v51 = vrot.slane %v71_v47, %v83_v46  ;;  %v80_v52 = vrot.slane %v71_v47, %v79_v48  ;;  %v599_v12 = vld [vmem:[%s920_s4] ss:$0 sm:$0xff] }
  0x48   :  { %v88_v53 = vrot.slane %v71_v47, %v87_v49 }
  0x4a   :  { %637 = vmatpush3.bf16.msra.mxu0 %v707_v21  ;;  %659 = vmatpush3.bf16.msra.mxu1 %v708_v22 }
  0x4b   :  { %638 = vmatprep.subr.bf16.mxu0 %v709_v23  ;;  %660 = vmatprep.subr.bf16.mxu1 %v710_v24 }
  0x4e   :  { %639 = vmatpush3.bf16.msra.mxu0 %v711_v25  ;;  %661 = vmatpush3.bf16.msra.mxu1 %v712_v26 }
  0x4f   :  { %640 = vmatprep.subr.bf16.mxu0 %v713_v27  ;;  %662 = vmatprep.subr.bf16.mxu1 %v714_v28 }
  0x52   :  { %641 = vmatpush3.bf16.msra.mxu0 %v715_v29  ;;  %663 = vmatpush3.bf16.msra.mxu1 %v716_v30 }
  0x53   :  { %642 = vmatprep.subr.bf16.mxu0 %v717_v31  ;;  %664 = vmatprep.subr.bf16.mxu1 %v718_v32 }
  0x56   :  { %643 = vmatpush3.bf16.msra.mxu0 %v719_v33  ;;  %665 = vmatpush3.bf16.msra.mxu1 %v720_v34 }
  0x57   :  { %644 = vmatprep.subr.bf16.mxu0 %v721_v35  ;;  %666 = vmatprep.subr.bf16.mxu1 %v722_v36 }
  0x5a   :  { %645 = vmatpush3.bf16.msra.mxu0 %v723_v37  ;;  %667 = vmatpush3.bf16.msra.mxu1 %v724_v38 }
  0x5b   :  { %646 = vmatprep.subr.bf16.mxu0 %v725_v39  ;;  %668 = vmatprep.subr.bf16.mxu1 %v726_v40 }
  0x5e   :  { %647 = vmatpush3.bf16.msra.mxu0 %v727_v41  ;;  %669 = vmatpush3.bf16.msra.mxu1 %v728_v42 }
 0x114   :  { %v171_v54 = vpop.f32.mrb[0].mxu0  ;;  %v212_v55 = vpop.f32.mrb[0].mxu1 }
 0x115   :  { %v172_v56 = vadd.f32 %v171_v54, %v76_v50  ;;  %v213_v57 = vadd.f32 %v212_v55, %v84_v51  ;;  %v173_v58 = vpop.f32.mrb[1].mxu0  ;;  %v214_v59 = vpop.f32.mrb[1].mxu1 }
 0x116   :  { %v174_v60 = vadd.f32 %v173_v58, %v80_v52  ;;  %v215_v61 = vadd.f32 %v214_v59, %v88_v53  ;;  %v175_v62 = vpop.f32.mrb[2].mxu0  ;;  %v216_v63 = vpop.f32.mrb[2].mxu1 }
 0x117   :  { %v219_v0 = vmax.f32 %v172_v56, 0.0  ;;  %v221_v1 = vmax.f32 %v213_v57, 0.0  ;;  %v176_v2 = vpop.f32.mrb[3].mxu0  ;;  %v217_v3 = vpop.f32.mrb[3].mxu1 }
 0x118   :  { %v220_v4 = vmax.f32 %v174_v60, 0.0  ;;  %v222_v5 = vmax.f32 %v215_v61, 0.0 }
 0x119   :  { %v225_v6 = vpack.c.bf16 %v221_v1, %v221_v1  ;;  %v223_v9 = vpack.c.bf16 %v219_v0, %v219_v0 }
 0x11a   :  { %v224_v7 = vpack.c.bf16 %v220_v4, %v220_v4  ;;  %v226_v8 = vpack.c.bf16 %v222_v5, %v222_v5 }
 0x11c   :  { %522 = vmatprep.mubr.bf16.mxu0 %v224_v7  ;;  %562 = vmatprep.mubr.bf16.mxu1 %v226_v8 }
 0x11d   :  { %523 = vmatmul.mubr.bf16.vlgmr.msra.gmra.mrb[4].mxu0 %v223_v9  ;;  %563 = vmatmul.mubr.bf16.vlgmr.msra.gmra.mrb[4].mxu1 %v225_v6 }
 0x1f0   :  { %v648_v10 = vpop.f32.mrb[4].mxu0  ;;  %v670_v11 = vpop.f32.mrb[4].mxu1 }
 0x1f1   :  { %v649_v13 = vpop.f32.mrb[5].mxu0  ;;  %v671_v14 = vpop.f32.mrb[5].mxu1 }
 0x1f2   :  { %v650_v15 = vadd.f32 %v649_v13, %v648_v10  ;;  %v672_v16 = vadd.f32 %v671_v14, %v670_v11  ;;  %v651_v17 = vpop.f32.mrb[6].mxu0  ;;  %v673_v18 = vpop.f32.mrb[6].mxu1 }
 0x1f3   :  { %v652_v19 = vpop.f32.mrb[7].mxu0  ;;  %v674_v20 = vpop.f32.mrb[7].mxu1 }
 0x1f4   :  { %v525_v21 = vadd.f32 %v650_v15, %v599_v12 }
 0x1f6   :  { %v565_v22 = vadd.f32 %v672_v16, %v525_v21 }
 0x1f8   :  { %v570_v23 = vmax.f32 %v565_v22, 0.0 }
 0x1fa   :  { %v571_v24 = vpack.c.bf16 %v570_v23, %v570_v23 }
 0x1fc   :  { %572 = vst [vmem:[#allocation8] sm:$0xf] %v571_v24 }
 0x1fd   :  { %806 = shalt.err (!%p803_p0)
}
 0x1fe   :  { %s807_s12 = scalar_lea.hbm %s921_s5, 64 }
 0x1ff   :  { %p808_p1 = scmp.ne.s32.totalorder %s921_s5, %s807_s12  ;;  %p811_p2 = scmp.lt.u32.totalorder %s807_s12, %s921_s5 }
 0x201   :  { %p813_p3 = pnand %p811_p2, %p808_p1 }
 0x203   :  { %816 = shalt.err (!%p813_p3)
}
 0x204   :  { %582 = dma.vmem_to_hbm [thread:$0]  %s580_s9, 64, %s921_s5, [#allocation4]  }
 0x205   :  { %821 = dma.done.wait [#allocation4], 64  }
 0x206   :  { %822 = vsyncadd [#allocation4], 4294967232 }
 0x207   :  { %586 = vsyncpa [#allocation3], 1 }
 0x208   :  { %587 = vsyncpa [#allocation6], 1 }
 0x209   :  { %588 = vsyncpa [#allocation4], 1 }

</bundles_post_ra>
